<compile_context>
chip_gen: v7x
topology: tpu7x:2x2x1
jax: 0.10.0
libtpu: 0.0.40
codegen_flags: <defaults>
</compile_context>

<pallas_src>
import functools
import math

import jax
import jax.numpy as jnp
from jax import lax
from jax.experimental import pallas as pl
from jax.experimental.pallas import tpu as pltpu

_LANE = 128  # lane width: output feature dim is padded to a multiple of this


def _round_up(x, m):
    return ((x + m - 1) // m) * m


def _mlp_kernel(obs_ref, w1_ref, b1_ref, w2_ref, b2_ref, w3_ref, b3_ref, q_ref,
                *, sub, n_sub):
    """Fused 3-layer MLP on one (tm, obs_dim) batch tile, processed in `sub`-row chunks."""

    def body(r, carry):
        row0 = pl.multiple_of(r * sub, sub)
        rows = pl.ds(row0, sub)
        # fc1 + relu  (bf16 operands -> f32 accumulate, f32 epilogue)
        x = obs_ref[rows, :].astype(jnp.bfloat16)
        h1 = jnp.dot(x, w1_ref[...], preferred_element_type=jnp.float32)
        h1 = jnp.maximum(h1 + b1_ref[...], 0.0)
        # fc2 + relu
        h2 = jnp.dot(h1.astype(jnp.bfloat16), w2_ref[...], preferred_element_type=jnp.float32)
        h2 = jnp.maximum(h2 + b2_ref[...], 0.0)
        # fc3 (no activation) -> lane-dense padded Q slab, stored bf16
        q = jnp.dot(h2.astype(jnp.bfloat16), w3_ref[...], preferred_element_type=jnp.float32)
        q_ref[rows, :] = (q + b3_ref[...]).astype(q_ref.dtype)
        return carry

    # Unrolled fixed-trip inner loop: LLO scheduler visibility, bounded vreg live ranges.
    lax.fori_loop(0, n_sub, body, None, unroll=True)


def cartpole_forward(obs, params, *, tm_max=512, sub_tile=256):
    """obs: [B, obs_dim] float32. params: dict of bf16 weights / f32 biases.
    Returns Q: [B, act_dim] float32."""
    w1, b1, w2, b2, w3, b3 = (
        params["w1"], params["b1"], params["w2"], params["b2"], params["w3"], params["b3"]
    )
    B, obs_dim = obs.shape
    hid1 = w1.shape[1]
    hid2 = w2.shape[1]
    act_dim = w3.shape[1]

    # --- Lane-dense output: zero-pad fc3 to a multiple of 128 output columns. ---
    n_out = max(_LANE, _round_up(act_dim, _LANE))
    if act_dim < n_out:
        w3p = jnp.zeros((hid2, n_out), w3.dtype).at[:, :act_dim].set(w3)
        b3p = jnp.zeros((1, n_out), b3.dtype).at[:, :act_dim].set(b3)
    else:
        w3p, b3p = w3, b3

    # --- Batch tile selection (regime-aware). ---
    if B <= tm_max:
        # Small/inference batches: single grid step, pad only to the bf16 sublane pack (16).
        tm = max(16, _round_up(B, 16))
    else:
        # Large batches: big tiles amortize the ~600-cycle per-grid-step overhead.
        tm = tm_max

    # Inner M sub-tile: 256 rows fills v6e/v7x's 256-wide MXU and bounds vreg pressure.
    if tm % sub_tile == 0:
        sub = sub_tile
    elif tm % 128 == 0:
        sub = 128
    else:
        sub = tm  # tiny single-tile case: one shot
    n_sub = tm // sub

    n_tiles = pl.cdiv(B, tm)
    B_pad = n_tiles * tm
    if B_pad != B:
        obs_p = jnp.zeros((B_pad, obs_dim), obs.dtype).at[:B].set(obs)
    else:
        obs_p = obs

    # Advisory cost hint for XLA scheduling around the custom call.
    flops = 2 * B_pad * (obs_dim * hid1 + hid1 * hid2 + hid2 * n_out)
    bytes_accessed = (
        obs_p.size * obs_p.dtype.itemsize
        + w1.size * w1.dtype.itemsize + b1.size * b1.dtype.itemsize
        + w2.size * w2.dtype.itemsize + b2.size * b2.dtype.itemsize
        + w3p.size * w3p.dtype.itemsize + b3p.size * b3p.dtype.itemsize
        + B_pad * n_out * 2  # bf16 output slab
    )

    const2 = lambda a: pl.BlockSpec(a.shape, lambda i: (0, 0))  # VMEM-resident params

    kernel = functools.partial(_mlp_kernel, sub=sub, n_sub=n_sub)

    q_pad = pl.pallas_call(
        kernel,
        out_shape=jax.ShapeDtypeStruct((B_pad, n_out), jnp.bfloat16),
        grid=(n_tiles,),
        in_specs=[
            pl.BlockSpec((tm, obs_dim), lambda i: (i, 0)),  # obs tile marches over batch
            const2(w1), const2(b1),
            const2(w2), const2(b2),
            const2(w3p), const2(b3p),
        ],
        out_specs=pl.BlockSpec((tm, n_out), lambda i: (i, 0)),
        compiler_params=pltpu.CompilerParams(dimension_semantics=("parallel",)),
        cost_estimate=pl.CostEstimate(
            flops=int(flops), transcendentals=0, bytes_accessed=int(bytes_accessed)),
    )(obs_p, w1, b1, w2, b2, w3p, b3p)

    return q_pad[:B, :act_dim].astype(jnp.float32)


def init_params(key, obs_dim, act_dim, hid1=128, hid2=128):
    """Init mirroring nn.Linear default: U(-1/sqrt(fan_in), 1/sqrt(fan_in)).
    Weights stored [in, out] bf16 (MXU operands), biases f32 (f32 epilogue)."""
    keys = jax.random.split(key, 6)

    def linear(kw, kb, fan_in, fan_out):
        bound = 1.0 / math.sqrt(fan_in)
        w = jax.random.uniform(kw, (fan_in, fan_out), jnp.float32, -bound, bound)
        b = jax.random.uniform(kb, (1, fan_out), jnp.float32, -bound, bound)
        return w.astype(jnp.bfloat16), b

    w1, b1 = linear(keys[0], keys[1], obs_dim, hid1)
    w2, b2 = linear(keys[2], keys[3], hid1, hid2)
    w3, b3 = linear(keys[4], keys[5], hid2, act_dim)
    return {"w1": w1, "b1": b1, "w2": w2, "b2": b2, "w3": w3, "b3": b3}


def reference_forward(obs, params):
    """Plain-JAX reference with identical math (bf16 dot operands, f32 accumulate/epilogue,
    final bf16 rounding to mirror the kernel's bf16 output slab).
    NOTE: bf16 operands diverge from a pure-fp32 PyTorch CartPoleModel by ~1e-2 relative;
    acceptable for RL Q-values."""
    f32 = jnp.float32
    h1 = jnp.maximum(
        jnp.dot(obs.astype(jnp.bfloat16), params["w1"], preferred_element_type=f32)
        + params["b1"], 0.0)
    h2 = jnp.maximum(
        jnp.dot(h1.astype(jnp.bfloat16), params["w2"], preferred_element_type=f32)
        + params["b2"], 0.0)
    q = (jnp.dot(h2.astype(jnp.bfloat16), params["w3"], preferred_element_type=f32)
         + params["b3"])
    return q.astype(jnp.bfloat16).astype(f32)


if __name__ == "__main__":
    obs_dim, act_dim = 4, 2  # CartPole-v1: 4 observations, 2 actions

    key = jax.random.PRNGKey(0)
    k_params, k_obs = jax.random.split(key)
    params = init_params(k_params, obs_dim, act_dim)

    # Small inference-style batch: single grid step, tm = 16 (no padding to 128).
    batch = 8
    obs = jax.random.normal(k_obs, (batch, obs_dim), jnp.float32)
    q = jax.block_until_ready(cartpole_forward(obs, params))
    q_ref = reference_forward(obs, params)
    assert q.shape == (batch, act_dim)
    assert jnp.allclose(q, q_ref, atol=1e-2, rtol=1e-2), "mismatch vs JAX reference (small B)"

    # Larger batch: exercises tm=512 tiles, 256-row inner sub-tiles and the multi-tile grid.
    batch_big = 1536
    obs_big = jax.random.normal(jax.random.PRNGKey(1), (batch_big, obs_dim), jnp.float32)
    q_big = jax.block_until_ready(cartpole_forward(obs_big, params))
    q_big_ref = reference_forward(obs_big, params)
    assert q_big.shape == (batch_big, act_dim)
    assert jnp.allclose(q_big, q_big_ref, atol=1e-2, rtol=1e-2), "mismatch vs JAX reference (large B)"

    print("KERNEL_OK")
</pallas_src>

<mosaic_0001>
module attributes {stable_mosaic.version = 11 : i64} {
  func.func @_mlp_kernel(%arg0: i32, %arg1: memref<16x4xf32, #tpu.memory_space<vmem>>, %arg2: memref<4x128xbf16, #tpu.memory_space<vmem>>, %arg3: memref<1x128xf32, #tpu.memory_space<vmem>>, %arg4: memref<128x128xbf16, #tpu.memory_space<vmem>>, %arg5: memref<1x128xf32, #tpu.memory_space<vmem>>, %arg6: memref<128x128xbf16, #tpu.memory_space<vmem>>, %arg7: memref<1x128xf32, #tpu.memory_space<vmem>>, %arg8: memref<16x128xbf16, #tpu.memory_space<vmem>>) attributes {dimension_semantics = [#tpu.dimension_semantics<parallel>], iteration_bounds = array<i64: 1>, scalar_prefetch = 0 : i64, scratch_operands = 0 : i64, tpu.core_type = #tpu.core_type<tc>, window_params = [{transform_indices = @transform_0, window_bounds = array<i64: 16, 4>}, {pipeline_mode = #tpu.pipeline_mode<synchronous>, transform_indices = @transform_1, window_bounds = array<i64: 4, 128>}, {pipeline_mode = #tpu.pipeline_mode<synchronous>, transform_indices = @transform_2, window_bounds = array<i64: 1, 128>}, {pipeline_mode = #tpu.pipeline_mode<synchronous>, transform_indices = @transform_3, window_bounds = array<i64: 128, 128>}, {pipeline_mode = #tpu.pipeline_mode<synchronous>, transform_indices = @transform_4, window_bounds = array<i64: 1, 128>}, {pipeline_mode = #tpu.pipeline_mode<synchronous>, transform_indices = @transform_5, window_bounds = array<i64: 128, 128>}, {pipeline_mode = #tpu.pipeline_mode<synchronous>, transform_indices = @transform_6, window_bounds = array<i64: 1, 128>}, {transform_indices = @transform_7, window_bounds = array<i64: 16, 128>}]} {
    %c0_i32 = arith.constant 0 : i32
    %c16_i32 = arith.constant 16 : i32
    %0 = arith.muli %c0_i32, %c16_i32 : i32
    %1 = tpu.assume_multiple %0, 16 : i32
    %2 = arith.index_cast %1 : i32 to index
    %c0 = arith.constant 0 : index
    %3 = vector.load %arg1[%2, %c0] : memref<16x4xf32, #tpu.memory_space<vmem>>, vector<16x4xf32>
    %4 = arith.truncf %3 : vector<16x4xf32> to vector<16x4xbf16>
    %c0_0 = arith.constant 0 : index
    %c0_1 = arith.constant 0 : index
    %5 = vector.load %arg2[%c0_0, %c0_1] : memref<4x128xbf16, #tpu.memory_space<vmem>>, vector<4x128xbf16>
    %cst = arith.constant dense<0.000000e+00> : vector<16x128xf32>
    %6 = tpu.matmul %4, %5, %cst {dimension_numbers = #tpu.dot_dimension_numbers<[1], [0], [0], [1], [0, 0, 1, 1], [], []>} : vector<16x4xbf16>, vector<4x128xbf16>, vector<16x128xf32> -> vector<16x128xf32>
    %c0_2 = arith.constant 0 : index
    %c0_3 = arith.constant 0 : index
    %7 = vector.load %arg3[%c0_2, %c0_3] : memref<1x128xf32, #tpu.memory_space<vmem>>, vector<1x128xf32>
    %8 = vector.broadcast %7 : vector<1x128xf32> to vector<16x128xf32>
    %9 = arith.addf %6, %8 : vector<16x128xf32>
    %cst_4 = arith.constant 0.000000e+00 : f32
    %10 = vector.broadcast %cst_4 : f32 to vector<16x128xf32>
    %11 = arith.maximumf %9, %10 : vector<16x128xf32>
    %12 = arith.truncf %11 : vector<16x128xf32> to vector<16x128xbf16>
    %c0_5 = arith.constant 0 : index
    %c0_6 = arith.constant 0 : index
    %13 = vector.load %arg4[%c0_5, %c0_6] : memref<128x128xbf16, #tpu.memory_space<vmem>>, vector<128x128xbf16>
    %cst_7 = arith.constant dense<0.000000e+00> : vector<16x128xf32>
    %14 = tpu.matmul %12, %13, %cst_7 {dimension_numbers = #tpu.dot_dimension_numbers<[1], [0], [0], [1], [0, 0, 1, 1], [], []>} : vector<16x128xbf16>, vector<128x128xbf16>, vector<16x128xf32> -> vector<16x128xf32>
    %c0_8 = arith.constant 0 : index
    %c0_9 = arith.constant 0 : index
    %15 = vector.load %arg5[%c0_8, %c0_9] : memref<1x128xf32, #tpu.memory_space<vmem>>, vector<1x128xf32>
    %16 = vector.broadcast %15 : vector<1x128xf32> to vector<16x128xf32>
    %17 = arith.addf %14, %16 : vector<16x128xf32>
    %cst_10 = arith.constant 0.000000e+00 : f32
    %18 = vector.broadcast %cst_10 : f32 to vector<16x128xf32>
    %19 = arith.maximumf %17, %18 : vector<16x128xf32>
    %20 = arith.truncf %19 : vector<16x128xf32> to vector<16x128xbf16>
    %c0_11 = arith.constant 0 : index
    %c0_12 = arith.constant 0 : index
    %21 = vector.load %arg6[%c0_11, %c0_12] : memref<128x128xbf16, #tpu.memory_space<vmem>>, vector<128x128xbf16>
    %cst_13 = arith.constant dense<0.000000e+00> : vector<16x128xf32>
    %22 = tpu.matmul %20, %21, %cst_13 {dimension_numbers = #tpu.dot_dimension_numbers<[1], [0], [0], [1], [0, 0, 1, 1], [], []>} : vector<16x128xbf16>, vector<128x128xbf16>, vector<16x128xf32> -> vector<16x128xf32>
    %c0_14 = arith.constant 0 : index
    %c0_15 = arith.constant 0 : index
    %23 = vector.load %arg7[%c0_14, %c0_15] : memref<1x128xf32, #tpu.memory_space<vmem>>, vector<1x128xf32>
    %24 = vector.broadcast %23 : vector<1x128xf32> to vector<16x128xf32>
    %25 = arith.addf %22, %24 : vector<16x128xf32>
    %26 = arith.truncf %25 : vector<16x128xf32> to vector<16x128xbf16>
    %27 = arith.index_cast %1 : i32 to index
    %c0_16 = arith.constant 0 : index
    %28 = vector.load %arg8[%27, %c0_16] : memref<16x128xbf16, #tpu.memory_space<vmem>>, vector<16x128xbf16>
    tpu.vector_store %arg8[%27, %c0_16], %26 {strides = array<i32>} : memref<16x128xbf16, #tpu.memory_space<vmem>>, vector<16x128xbf16>,
    %c1_i32 = arith.constant 1 : i32
    return
  }
  func.func @transform_0(%arg0: i32) -> (i32, i32) {
    %c0_i32 = arith.constant 0 : i32
    %c0_i32_0 = arith.constant 0 : i32
    return %arg0, %c0_i32 : i32, i32
  }
  func.func @transform_1(%arg0: i32) -> (i32, i32) {
    %c0_i32 = arith.constant 0 : i32
    %c0_i32_0 = arith.constant 0 : i32
    %c0_i32_1 = arith.constant 0 : i32
    return %c0_i32, %c0_i32_0 : i32, i32
  }
  func.func @transform_2(%arg0: i32) -> (i32, i32) {
    %c0_i32 = arith.constant 0 : i32
    %c0_i32_0 = arith.constant 0 : i32
    %c0_i32_1 = arith.constant 0 : i32
    return %c0_i32, %c0_i32_0 : i32, i32
  }
  func.func @transform_3(%arg0: i32) -> (i32, i32) {
    %c0_i32 = arith.constant 0 : i32
    %c0_i32_0 = arith.constant 0 : i32
    %c0_i32_1 = arith.constant 0 : i32
    return %c0_i32, %c0_i32_0 : i32, i32
  }
  func.func @transform_4(%arg0: i32) -> (i32, i32) {
    %c0_i32 = arith.constant 0 : i32
    %c0_i32_0 = arith.constant 0 : i32
    %c0_i32_1 = arith.constant 0 : i32
    return %c0_i32, %c0_i32_0 : i32, i32
  }
  func.func @transform_5(%arg0: i32) -> (i32, i32) {
    %c0_i32 = arith.constant 0 : i32
    %c0_i32_0 = arith.constant 0 : i32
    %c0_i32_1 = arith.constant 0 : i32
    return %c0_i32, %c0_i32_0 : i32, i32
  }
  func.func @transform_6(%arg0: i32) -> (i32, i32) {
    %c0_i32 = arith.constant 0 : i32
    %c0_i32_0 = arith.constant 0 : i32
    %c0_i32_1 = arith.constant 0 : i32
    return %c0_i32, %c0_i32_0 : i32, i32
  }
  func.func @transform_7(%arg0: i32) -> (i32, i32) {
    %c0_i32 = arith.constant 0 : i32
    %c0_i32_0 = arith.constant 0 : i32
    return %arg0, %c0_i32 : i32, i32
  }
}

</mosaic_0001>

<bundles_post_ra>
// kernel: tpu_custom_call.1
= control target key start
LH: loop header
LB: loop body
LE: loop exit
PB: predicated region body
PF: predicated region fallthrough
CT: control target
= control target key end

     0   :  { %12 = vsyncpa [#allocation3], 0  ;;  %s697_s0 = inlined_call_operand.vmem [shape: f32[16,4], index: 0, kind: input, shape index: {}]   ;;  %s698_s1 = inlined_call_operand.vmem [shape: bf16[4,128], index: 1, kind: input, shape index: {}]   ;;  %s699_s2 = inlined_call_operand.vmem [shape: f32[1,128], index: 2, kind: input, shape index: {}]   ;;  %s700_s3 = inlined_call_operand.hbm [shape: bf16[128,128], index: 3, kind: input, shape index: {}]   ;;  %s701_s4 = inlined_call_operand.vmem [shape: f32[1,128], index: 4, kind: input, shape index: {}]   ;;  %s702_s5 = inlined_call_operand.hbm [shape: bf16[128,128], index: 5, kind: input, shape index: {}]   ;;  %s703_s6 = inlined_call_operand.vmem [shape: f32[1,128], index: 6, kind: input, shape index: {}]   ;;  %s704_s7 = inlined_call_operand.hbm [shape: bf16[16,128], index: 7, kind: output, shape index: {}]  }
   0x1   :  { %13 = vsyncpa [#allocation6], 0 }
   0x2   :  { %14 = vsyncpa [#allocation4], 0  ;;  %s564_s24 = smov [#allocation2]   ;;  %s492_s28 = scalar_lea.hbm %s700_s3, 1024 }
   0x3   :  { %s26_s25 = sshll.u32 %s564_s24, 4  ;;  %p493_p0 = scmp.ne.s32.totalorder %s700_s3, %s492_s28  ;;  %s27_s25 = int_to_ptr.vmem [resolvable:$true] %s26_s25 }
   0x4   :  { %p496_p1 = scmp.lt.u32.totalorder %s492_s28, %s700_s3 }
   0x6   :  { %p498_p2 = pnand %p496_p1, %p493_p0 }
   0x8   :  { %501 = shalt.err (!%p498_p2)
}
   0x9   :  { %s502_s10 = scalar_lea.vmem %s27_s25, 1024  ;;  %p507_p4 = scmp.lt.s32.totalorder %s27_s25, %s27_s25 }
   0xa   :  { %p503_p3 = scmp.ne.s32.totalorder %s27_s25, %s502_s10  ;;  %p508_p5 = scmp.lt.s32.totalorder %s502_s10, %s502_s10 }
   0xc   :  { %p509_p6 = por %p508_p5, %p507_p4 }
   0xe   :  { %p510_p7 = pnand %p509_p6, %p503_p3 }
  0x10   :  { %513 = shalt.err (!%p510_p7)
}
  0x11   :  { %s565_s11 = smov 64   ;;  %s566_s12 = smov 4  }
  0x12   :  { %32 = dma.hbm_to_vmem [thread:$0]  %s700_s3, 1024, %s27_s25, [#allocation3], %s565_s11, %s565_s11, %s566_s12  }
  0x13   :  { %s567_s15 = smov [#allocation5]   ;;  %s514_s19 = scalar_lea.hbm %s702_s5, 1024 }
  0x14   :  { %s40_s16 = sshll.u32 %s567_s15, 4  ;;  %p515_p8 = scmp.ne.s32.totalorder %s702_s5, %s514_s19  ;;  %s41_s16 = int_to_ptr.vmem [resolvable:$true] %s40_s16 }
  0x15   :  { %p518_p9 = scmp.lt.u32.totalorder %s514_s19, %s702_s5 }
  0x17   :  { %p520_p10 = pnand %p518_p9, %p515_p8 }
  0x19   :  { %523 = shalt.err (!%p520_p10)
}
  0x1a   :  { %s524_s24 = scalar_lea.vmem %s41_s16, 1024  ;;  %p529_p12 = scmp.lt.s32.totalorder %s41_s16, %s41_s16 }
  0x1b   :  { %p525_p11 = scmp.ne.s32.totalorder %s41_s16, %s524_s24  ;;  %p530_p13 = scmp.lt.s32.totalorder %s524_s24, %s524_s24 }
  0x1d   :  { %p531_p0 = por %p530_p13, %p529_p12 }
  0x1f   :  { %p532_p1 = pnand %p531_p0, %p525_p11 }
  0x21   :  { %535 = shalt.err (!%p532_p1)
}
  0x22   :  { %46 = dma.hbm_to_vmem [thread:$0]  %s702_s5, 1024, %s41_s16, [#allocation6], %s565_s11, %s565_s11, %s566_s12  }
  0x23   :  { %558 = dma.done.wait [#allocation3], 1024  }
  0x24   :  { %559 = vsyncadd [#allocation3], 4294966272 }
  0x25   :  { %560 = dma.done.wait [#allocation6], 1024  }
  0x26   :  { %561 = vsyncadd [#allocation6], 4294966272  ;;  %v568_v0 = vmov 0.0   ;;  %vm569_vm0 = vmmov 0   ;;  %vm71_vm1 = vcmask 1041408   ;;  %v56_v2 = vld [vmem:[%s697_s0] sm:$0xff] }
  0x27   :  { %423 = vmatprep.subr.bf16.mxu0 %v568_v0  ;;  %425 = vmatprep.mubr.msk.bf16.mxu0 %vm569_vm0, %v568_v0  ;;  %v59_v1 = vld [vmem:[%s698_s1] sm:$0x3]  ;;  %v57_v3 = vld [vmem:[%s697_s0 + $0x8] sm:$0xff]  ;;  %vm67_vm2 = vcmask 31744   ;;  %v478_v8 = vld [vmem:[#allocation2 + $0x10] sm:$0xff]   ;;  %s570_s13 = smov [#allocation7]  }
  0x28   :  { %429 = vmatprep.subr.bf16.mxu1 %v568_v0  ;;  %445 = vmatprep.mubr.msk.bf16.mxu1 %vm569_vm0, %v568_v0  ;;  %v73_v4 = vsel %vm71_vm1, %v59_v1, 0  ;;  %v58_v5 = vpack.c.bf16 %v57_v3, %v56_v2  ;;  %v476_v6 = vld [vmem:[#allocation2] sm:$0xff]   ;;  %v477_v7 = vld [vmem:[#allocation2 + $0x8] sm:$0xff]   ;;  %v479_v9 = vld [vmem:[#allocation2 + $0x18] sm:$0xff]   ;;  %s361_s14 = sshll.u32 %s570_s13, 4  ;;  %s362_s14 = int_to_ptr.vmem [resolvable:$true] %s361_s14 }
  0x29   :  { %424 = vmatpush3.bf16.msra.mxu0 %v73_v4  ;;  %430 = vmatpush3.bf16.msra.mxu1 %v476_v6  ;;  %v480_v10 = vld [vmem:[#allocation2 + $0x20] sm:$0xff]   ;;  %v481_v11 = vld [vmem:[#allocation2 + $0x28] sm:$0xff]   ;;  %v482_v12 = vld [vmem:[#allocation2 + $0x30] sm:$0xff]   ;;  %p541_p3 = scmp.lt.s32.totalorder %s362_s14, %s362_s14 }
  0x2a   :  { %449 = vmatprep.subr.bf16.mxu0 %v568_v0  ;;  %431 = vmatprep.subr.bf16.mxu1 %v568_v0  ;;  %v483_v13 = vld [vmem:[#allocation2 + $0x38] sm:$0xff]   ;;  %v484_v14 = vld [vmem:[#allocation5] sm:$0xff]   ;;  %v485_v15 = vld [vmem:[#allocation5 + $0x8] sm:$0xff]  }
  0x2b   :  { %v486_v16 = vld [vmem:[#allocation5 + $0x10] sm:$0xff]   ;;  %v487_v17 = vld [vmem:[#allocation5 + $0x18] sm:$0xff]   ;;  %v488_v18 = vld [vmem:[#allocation5 + $0x20] sm:$0xff]  }
  0x2c   :  { %426 = vmatmul.mubr.msk.bf16.vlgmr.msra.gmra.mrb[0].mxu0 %vm67_vm2, %v58_v5  ;;  %v489_v19 = vld [vmem:[#allocation5 + $0x28] sm:$0xff]   ;;  %v374_v20 = vld [vmem:[%s699_s2] ss:$0 sm:$0xff]  ;;  %v490_v30 = vld [vmem:[#allocation5 + $0x30] sm:$0xff]  }
  0x2d   :  { %465 = vmatprep.mubr.msk.bf16.mxu0 %vm569_vm0, %v568_v0  ;;  %432 = vmatpush3.bf16.msra.mxu1 %v477_v7  ;;  %v491_v31 = vld [vmem:[#allocation5 + $0x38] sm:$0xff]   ;;  %v376_v32 = vld [vmem:[%s701_s4] ss:$0 sm:$0xff]  ;;  %s536_s4 = scalar_lea.vmem %s362_s14, 128 }
  0x2e   :  { %433 = vmatprep.subr.bf16.mxu1 %v568_v0  ;;  %450 = vmatpush3.bf16.msra.mxu0 %v484_v14  ;;  %v385_v42 = vld [vmem:[%s703_s6] ss:$0 sm:$0xff]  ;;  %p537_p2 = scmp.ne.s32.totalorder %s362_s14, %s536_s4  ;;  %p542_p4 = scmp.lt.s32.totalorder %s536_s4, %s536_s4 }
  0x2f   :  { %451 = vmatprep.subr.bf16.mxu0 %v568_v0 }
  0x30   :  { %p543_p5 = por %p542_p4, %p541_p3 }
  0x31   :  { %434 = vmatpush3.bf16.msra.mxu1 %v478_v8 }
  0x32   :  { %435 = vmatprep.subr.bf16.mxu1 %v568_v0  ;;  %452 = vmatpush3.bf16.msra.mxu0 %v485_v15  ;;  %p544_p6 = pnand %p543_p5, %p537_p2 }
  0x33   :  { %453 = vmatprep.subr.bf16.mxu0 %v568_v0 }
  0x35   :  { %436 = vmatpush3.bf16.msra.mxu1 %v479_v9 }
  0x36   :  { %437 = vmatprep.subr.bf16.mxu1 %v568_v0  ;;  %454 = vmatpush3.bf16.msra.mxu0 %v486_v16 }
  0x37   :  { %455 = vmatprep.subr.bf16.mxu0 %v568_v0 }
  0x39   :  { %438 = vmatpush3.bf16.msra.mxu1 %v480_v10 }
  0x3a   :  { %439 = vmatprep.subr.bf16.mxu1 %v568_v0  ;;  %456 = vmatpush3.bf16.msra.mxu0 %v487_v17 }
  0x3b   :  { %457 = vmatprep.subr.bf16.mxu0 %v568_v0 }
  0x3d   :  { %440 = vmatpush3.bf16.msra.mxu1 %v481_v11 }
  0x3e   :  { %441 = vmatprep.subr.bf16.mxu1 %v568_v0  ;;  %458 = vmatpush3.bf16.msra.mxu0 %v488_v18 }
  0x3f   :  { %459 = vmatprep.subr.bf16.mxu0 %v568_v0 }
  0x41   :  { %442 = vmatpush3.bf16.msra.mxu1 %v482_v12 }
  0x42   :  { %443 = vmatprep.subr.bf16.mxu1 %v568_v0  ;;  %460 = vmatpush3.bf16.msra.mxu0 %v489_v19 }
  0x43   :  { %461 = vmatprep.subr.bf16.mxu0 %v568_v0 }
  0x45   :  { %444 = vmatpush3.bf16.msra.mxu1 %v483_v13 }
  0x46   :  { %462 = vmatpush3.bf16.msra.mxu0 %v490_v30 }
  0x47   :  { %463 = vmatprep.subr.bf16.mxu0 %v568_v0 }
  0x4a   :  { %464 = vmatpush3.bf16.msra.mxu0 %v491_v31 }
  0xff   :  { %v109_v21 = vpop.f32.mrb[0].mxu0 }
 0x100   :  { %v110_v22 = vadd.f32 %v374_v20, %v109_v21  ;;  %v427_v23 = vpop.f32.mrb[1].mxu0 }
 0x101   :  { %v112_v24 = vpop.f32.mrb[2].mxu0 }
 0x102   :  { %v113_v25 = vadd.f32 %v374_v20, %v112_v24  ;;  %v428_v26 = vpop.f32.mrb[3].mxu0  ;;  %v116_v27 = vmax.f32 %v110_v22, 0.0 }
 0x104   :  { %v117_v28 = vmax.f32 %v113_v25, 0.0 }
 0x106   :  { %v118_v29 = vpack.c.bf16 %v117_v28, %v116_v27 }
 0x108   :  { %446 = vmatmul.mubr.bf16.vlgmr.msra.gmra.mrb[0].mxu1 %v118_v29 }
 0x1db   :  { %v224_v33 = vpop.f32.mrb[0].mxu1 }
 0x1dc   :  { %v225_v34 = vadd.f32 %v376_v32, %v224_v33  ;;  %v447_v35 = vpop.f32.mrb[1].mxu1 }
 0x1dd   :  { %v227_v36 = vpop.f32.mrb[2].mxu1 }
 0x1de   :  { %v228_v37 = vadd.f32 %v376_v32, %v227_v36  ;;  %v448_v38 = vpop.f32.mrb[3].mxu1  ;;  %v231_v39 = vmax.f32 %v225_v34, 0.0 }
 0x1e0   :  { %v232_v40 = vmax.f32 %v228_v37, 0.0 }
 0x1e2   :  { %v233_v41 = vpack.c.bf16 %v232_v40, %v231_v39 }
 0x1e4   :  { %466 = vmatmul.mubr.bf16.vlgmr.msra.gmra.mrb[4].mxu0 %v233_v41 }
 0x2b7   :  { %v339_v43 = vpop.f32.mrb[4].mxu0 }
 0x2b8   :  { %v467_v44 = vpop.f32.mrb[5].mxu0  ;;  %v340_v46 = vadd.f32 %v385_v42, %v339_v43 }
 0x2b9   :  { %v342_v45 = vpop.f32.mrb[6].mxu0 }
 0x2ba   :  { %v343_v47 = vadd.f32 %v385_v42, %v342_v45  ;;  %v468_v48 = vpop.f32.mrb[7].mxu0 }
 0x2bc   :  { %v401_v49 = vpack.c.bf16 %v343_v47, %v340_v46 }
 0x2be   :  { %402 = vst [vmem:[#allocation7] sm:$0xff] %v401_v49  }
 0x2bf   :  { %547 = shalt.err (!%p544_p6)
}
 0x2c0   :  { %s548_s16 = scalar_lea.hbm %s704_s7, 128 }
 0x2c1   :  { %p549_p7 = scmp.ne.s32.totalorder %s704_s7, %s548_s16  ;;  %p552_p8 = scmp.lt.u32.totalorder %s548_s16, %s704_s7 }
 0x2c3   :  { %p554_p9 = pnand %p552_p8, %p549_p7 }
 0x2c5   :  { %557 = shalt.err (!%p554_p9)
}
 0x2c6   :  { %367 = dma.vmem_to_hbm [thread:$0]  %s362_s14, 128, %s704_s7, [#allocation4], %s565_s11, %s565_s11, %s566_s12  }
 0x2c7   :  { %562 = dma.done.wait [#allocation4], 128  }
 0x2c8   :  { %563 = vsyncadd [#allocation4], 4294967168 }
 0x2c9   :  { %371 = vsyncpa [#allocation3], 1 }
 0x2ca   :  { %372 = vsyncpa [#allocation6], 1 }
 0x2cb   :  { %373 = vsyncpa [#allocation4], 1 }

</bundles_post_ra>
